<compile_context>
chip_gen: v5e
topology: v5e:2x2
jax: 0.10.0
libtpu: 0.0.40
codegen_flags: <defaults>
</compile_context>

<pallas_src>
import jax
import jax.numpy as jnp
from jax.experimental import pallas as pl
from jax.experimental.pallas import tpu as pltpu

N_INPUT = 1
N_OUTPUT = 1

LANES = 128              # vreg lane width (last dim)
MIN_TILE_ROWS = 8        # f32 sublane count
MAX_TILE_ROWS = 2048     # 2048 x 128 x 4 B = 1 MiB per block buffer
SMALL_TOTAL = 64 * 1024  # below this, a fused XLA FMA beats the launch cost


def linear_kernel(x_ref, wb_ref, o_ref):
    # wb_ref: (2,) f32 in SMEM -> [weight, bias].  Pure VPU fused multiply-add
    # on a lane-dense (tile_rows, 128) block.
    w = wb_ref[0]
    b = wb_ref[1]
    o_ref[...] = (x_ref[...] * w + b).astype(o_ref.dtype)


def _round_down8(n):
    return max(MIN_TILE_ROWS, (n // MIN_TILE_ROWS) * MIN_TILE_ROWS)


def _pick_tile_rows(rows):
    if rows <= MIN_TILE_ROWS:
        return rows                       # block == full dim (always legal)
    tile = _round_down8(min(rows, MAX_TILE_ROWS))
    if pl.cdiv(rows, tile) == 1 and rows >= 2 * MIN_TILE_ROWS:
        # Ensure >=2 grid steps so "parallel" shards over v7x's 2 TensorCores
        # (harmless on v5e / v6e: same tiles, sequential).
        half = pl.cdiv(rows, 2)
        tile = ((half + MIN_TILE_ROWS - 1) // MIN_TILE_ROWS) * MIN_TILE_ROWS
    return tile


def net_forward(x, weight, bias, *, force_pallas=False):
    """Pallas equivalent of Net.forward: self.l1(x) with l1 = nn.Linear(1, 1).

    x:      (batch, 1) float32
    weight: (1, 1)     float32   (torch layout: (n_out, n_in))
    bias:   (1,)       float32
    returns (batch, 1) float32
    """
    batch, n_in = x.shape
    assert n_in == N_INPUT and weight.shape == (N_OUTPUT, N_INPUT)
    assert bias.shape == (N_OUTPUT,)
    assert x.dtype == jnp.float32, "kernel layout specialised for float32"

    w = weight.reshape(()).astype(jnp.float32)
    b = bias.reshape(()).astype(jnp.float32)
    total = batch * N_INPUT

    # Small-batch fast path: a single fused XLA elementwise op is strictly
    # faster than a pallas_call launch + DMA setup.
    if total < SMALL_TOTAL and not force_pallas:
        return x * w + b

    # ---- lane-dense layout: (rows, 128).  reshape is free. ----
    flat = x.reshape(-1)
    rem = total % LANES
    padded = rem != 0
    if padded:
        # Ragged tail only: minimal pad to the next lane multiple.  Batches
        # that are multiples of 128 take the copy-free path (no pad/slice).
        flat = jnp.pad(flat, (0, LANES - rem))
    rows = flat.shape[0] // LANES
    x2d = flat.reshape(rows, LANES)

    tile_rows = _pick_tile_rows(rows)
    grid = (pl.cdiv(rows, tile_rows),)   # Pallas clips the final partial block

    wb = jnp.stack([w, b])               # (2,) f32 scalars for SMEM
    n_elems = rows * LANES

    out2d = pl.pallas_call(
        linear_kernel,
        out_shape=jax.ShapeDtypeStruct((rows, LANES), x.dtype),
        grid=grid,
        in_specs=[
            pl.BlockSpec((tile_rows, LANES), lambda i: (i, 0)),
            pl.BlockSpec(memory_space=pltpu.MemorySpace.SMEM),
        ],
        out_specs=pl.BlockSpec((tile_rows, LANES), lambda i: (i, 0)),
        compiler_params=pltpu.CompilerParams(
            dimension_semantics=("parallel",),
        ),
        cost_estimate=pl.CostEstimate(
            flops=2 * n_elems,
            transcendentals=0,
            bytes_accessed=2 * 4 * n_elems,   # one f32 read + one f32 write
        ),
    )(x2d, wb)

    if padded:
        return out2d.reshape(-1)[:total].reshape(batch, N_OUTPUT)
    return out2d.reshape(batch, N_OUTPUT)


if __name__ == "__main__":
    key = jax.random.PRNGKey(0)
    kx, kw, kb = jax.random.split(key, 3)

    # nn.Linear(1, 1) init shapes (torch stores weight as (n_out, n_in)).
    bound = 1.0 / (N_INPUT ** 0.5)
    weight = jax.random.uniform(kw, (N_OUTPUT, N_INPUT), jnp.float32, -bound, bound)
    bias = jax.random.uniform(kb, (N_OUTPUT,), jnp.float32, -bound, bound)

    # 1) Kernel path, batch multiple of 128 -> copy-free (no pad, no slice).
    x = jax.random.normal(kx, (1024, N_INPUT), jnp.float32)
    out = jax.block_until_ready(net_forward(x, weight, bias, force_pallas=True))
    ref = x @ weight.T + bias
    assert out.shape == (1024, N_OUTPUT)
    assert jnp.allclose(out, ref, atol=1e-5, rtol=1e-5)

    # 2) Ragged batch -> minimal tail pad + partial-block clipping.
    x_r = jax.random.normal(kx, (1000, N_INPUT), jnp.float32)
    out_r = jax.block_until_ready(net_forward(x_r, weight, bias, force_pallas=True))
    assert jnp.allclose(out_r, x_r @ weight.T + bias, atol=1e-5, rtol=1e-5)

    # 3) Small-batch fast path (plain fused XLA FMA).
    x_s = jax.random.normal(kx, (8, N_INPUT), jnp.float32)
    out_s = jax.block_until_ready(net_forward(x_s, weight, bias))
    assert jnp.allclose(out_s, x_s @ weight.T + bias, atol=1e-5, rtol=1e-5)

    print("KERNEL_OK")
</pallas_src>

<mosaic_0001>
module attributes {stable_mosaic.version = 11 : i64} {
  func.func @linear_kernel(%arg0: i32, %arg1: memref<8x128xf32, #tpu.memory_space<vmem>>, %arg2: memref<2xf32, #tpu.memory_space<smem>>, %arg3: memref<8x128xf32, #tpu.memory_space<vmem>>) attributes {dimension_semantics = [#tpu.dimension_semantics<parallel>], iteration_bounds = array<i64: 1>, scalar_prefetch = 0 : i64, scratch_operands = 0 : i64, tpu.core_type = #tpu.core_type<tc>, window_params = [{transform_indices = @transform_0, window_bounds = array<i64: 8, 128>}, {transform_indices = @transform_1, window_bounds = array<i64: 2>}, {transform_indices = @transform_2, window_bounds = array<i64: 8, 128>}]} {
    %c0 = arith.constant 0 : index
    %0 = memref.load %arg2[%c0] : memref<2xf32, #tpu.memory_space<smem>>
    %c1 = arith.constant 1 : index
    %1 = memref.load %arg2[%c1] : memref<2xf32, #tpu.memory_space<smem>>
    %c0_0 = arith.constant 0 : index
    %c0_1 = arith.constant 0 : index
    %2 = vector.load %arg1[%c0_0, %c0_1] : memref<8x128xf32, #tpu.memory_space<vmem>>, vector<8x128xf32>
    %3 = vector.broadcast %0 : f32 to vector<8x128xf32>
    %4 = arith.mulf %2, %3 : vector<8x128xf32>
    %5 = vector.broadcast %1 : f32 to vector<8x128xf32>
    %6 = arith.addf %4, %5 : vector<8x128xf32>
    %c0_2 = arith.constant 0 : index
    %c0_3 = arith.constant 0 : index
    %7 = vector.load %arg3[%c0_2, %c0_3] : memref<8x128xf32, #tpu.memory_space<vmem>>, vector<8x128xf32>
    tpu.vector_store %arg3[%c0_2, %c0_3], %6 {strides = array<i32>} : memref<8x128xf32, #tpu.memory_space<vmem>>, vector<8x128xf32>,
    return
  }
  func.func @transform_0(%arg0: i32) -> (i32, i32) {
    %c0_i32 = arith.constant 0 : i32
    %c0_i32_0 = arith.constant 0 : i32
    return %arg0, %c0_i32 : i32, i32
  }
  func.func @transform_1(%arg0: i32) -> i32 {
    %c0_i32 = arith.constant 0 : i32
    %c0_i32_0 = arith.constant 0 : i32
    return %c0_i32 : i32
  }
  func.func @transform_2(%arg0: i32) -> (i32, i32) {
    %c0_i32 = arith.constant 0 : i32
    %c0_i32_0 = arith.constant 0 : i32
    return %arg0, %c0_i32 : i32, i32
  }
}

</mosaic_0001>

<bundles_post_ra>
// kernel: tpu_custom_call.1
= control target key start
LH: loop header
LB: loop body
LE: loop exit
PB: predicated region body
PF: predicated region fallthrough
CT: control target
= control target key end

     0   :  { %7 = vsyncpa [#allocation3], 0  ;;  %s162_s0 = inlined_call_operand.hbm [shape: f32[8,128], index: 0, kind: input, shape index: {}]   ;;  %s163_s1 = inlined_call_operand.hbm [shape: f32[2], index: 1, kind: input, shape index: {}]   ;;  %s164_s2 = inlined_call_operand.hbm [shape: f32[8,128], index: 2, kind: output, shape index: {}]  }
   0x1   :  { %8 = vsyncpa [#allocation5], 0 }
   0x2   :  { %9 = vsyncpa [#allocation4], 0  ;;  %s15_s11 = sshll.u32 %s162_s0, 4  ;;  %s135_s12 = smov [#allocation2]   ;;  %s16_s11 = int_to_ptr.hbm [resolvable:$true] %s15_s11 }
   0x3   :  { %s17_s13 = sshll.u32 %s135_s12, 4  ;;  %s26_s16 = sshll.u32 %s163_s1, 4  ;;  %s18_s13 = int_to_ptr.vmem [resolvable:$true] %s17_s13  ;;  %s27_s16 = int_to_ptr.hbm [resolvable:$true] %s26_s16 }
   0x4   :  { %20 = dma.hbm_to_vmem [thread:$0]  %s16_s11, 128, %s18_s13, [#allocation3]  }
   0x5   :  { %s136_s17 = smov [#allocation6]  }
   0x6   :  { %29 = dma.hbm_to_smem %s27_s16, 16, %s136_s17, [#allocation5]  }
   0x7   :  { %129 = dma.done.wait [#allocation3], 128  }
   0x8   :  { %130 = vsyncadd [#allocation3], 4294967168 }
   0x9   :  { %131 = dma.done.wait [#allocation5], 16  }
   0xa   :  { %132 = vsyncadd [#allocation5], 4294967280 }
   0xb   :  { %38 = sfence }
   0xc   :  { %s39_s18 = sld [smem:[#allocation6]]  ;;  %v41_v0 = vld [vmem:[#allocation2] sm:$0xff]  ;;  %s137_s0 = smov [#allocation7]  }
   0xd   :  { %s65_s19 = sld [smem:[#allocation6 + $0x1]]  ;;  %s52_s20 = sshll.u32 %s137_s0, 4  ;;  %s53_s20 = int_to_ptr.vmem [resolvable:$true] %s52_s20 }
   0xe   :  { %s54_s23 = sshll.u32 %s164_s2, 4  ;;  %s55_s23 = int_to_ptr.hbm [resolvable:$true] %s54_s23 }
  0x12   :  { %v42_v1 = vstv %s39_s18 }
  0x13   :  { %v43_v2 = vmul.f32 %v42_v1, %v41_v0  ;;  %v44_v3 = vstv %s65_s19 }
  0x15   :  { %v45_v4 = vadd.f32 %v44_v3, %v43_v2 }
  0x17   :  { %46 = vst [vmem:[#allocation7] sm:$0xff] %v45_v4 }
  0x18   :  { %57 = dma.vmem_to_hbm [thread:$0]  %s53_s20, 128, %s55_s23, [#allocation4]  }
  0x19   :  { %133 = dma.done.wait [#allocation4], 128  }
  0x1a   :  { %134 = vsyncadd [#allocation4], 4294967168 }
  0x1b   :  { %62 = vsyncpa [#allocation3], 1 }
  0x1c   :  { %63 = vsyncpa [#allocation4], 1 }
  0x1d   :  { %64 = vsyncpa [#allocation5], 1 }

</bundles_post_ra>
